<compile_context>
chip_gen: v5e
topology: v5e:2x2
jax: 0.10.0
libtpu: 0.0.40
codegen_flags: <defaults>
</compile_context>

<pallas_src>
import functools

import jax
import jax.numpy as jnp
from jax import lax
from jax.experimental import pallas as pl
from jax.experimental.pallas import tpu as pltpu


def _round_up(x, m):
    return (x + m - 1) // m * m


# ----------------------------------------------------------------------------- kernel
def _inverted_residual_kernel(stride, dilation, Wp, r0, use_res,
                              x_ref, w1_ref, b1_ref, wd_ref, b2_ref,
                              w2_ref, b3_ref, o_ref):
    """One batch image per grid step; channel-major flat-spatial layout.

    x_ref  : (1, Cin, Lin)   fixed-padded input, spatial flattened with row pitch Wp,
                             zero-extended to Lin (multiple of 128)
    w1_ref : (Chid, Cin)     1x1 expand weights with BN1 scale folded in
    b1_ref : (Chid, 1)       folded BN1 bias
    wd_ref : (Chid, 9)       3x3 depthwise weights (tap k = di*3+dj) with BN2 scale folded
    b2_ref : (Chid, 1)       folded BN2 bias
    w2_ref : (Cout, Chid)    1x1 project weights with BN3 scale folded in
    b3_ref : (Cout, 1)       folded BN3 bias
    o_ref  : (1, Cout, Lout) flat output (row pitch Wp); wrapper extracts (H_out, W_out)
    """
    Cin = x_ref.shape[1]
    Chid = w1_ref.shape[0]
    Lout = o_ref.shape[2]

    xp = x_ref[0]                                                    # (Cin, Lin)

    # ---- 1x1 expand conv + folded BN + ReLU6.
    # MXU orientation: M=Chid, K=Cin, N=flat spatial (lane dense, multiple of 128).
    h1 = jnp.dot(w1_ref[...], xp, preferred_element_type=jnp.float32)  # (Chid, Lin)
    h1 = jnp.clip(h1 + b1_ref[...], 0.0, 6.0)

    # ---- 3x3 depthwise conv (VALID padding, stride / dilation) on the flat layout.
    # Output position q = h*Wp + w reads input flat index stride*q + (di*Wp + dj)*dilation,
    # so every tap is one contiguous (or lane-strided) window + per-channel broadcast FMA.
    acc = None
    for di in range(3):
        for dj in range(3):
            s = (di * Wp + dj) * dilation
            if stride == 1:
                win = lax.slice(h1, (0, s), (Chid, s + Lout))
            else:
                win = lax.slice(h1, (0, s),
                                (Chid, s + stride * (Lout - 1) + 1),
                                (1, stride))
            k = di * 3 + dj
            tap = win * wd_ref[:, k:k + 1]                           # (Chid, Lout)
            acc = tap if acc is None else acc + tap

    # ---- folded BN + ReLU6 on the depthwise output.
    h2 = jnp.clip(acc + b2_ref[...], 0.0, 6.0)                       # (Chid, Lout)

    # ---- 1x1 project conv + folded BN.
    out = jnp.dot(w2_ref[...], h2, preferred_element_type=jnp.float32)  # (Cout, Lout)
    out = out + b3_ref[...]

    if use_res:
        # Residual taken from the centre of the (single) padded input stream.
        out = out + lax.slice(xp, (0, r0), (Cin, r0 + Lout))

    o_ref[0] = out.astype(o_ref.dtype)


# ----------------------------------------------------------------------------- wrapper
def inverted_residual(x, params, *, stride, dilation, use_res):
    """x: (N, Cin, H, W) float32 (NCHW, matching the PyTorch module)."""
    N, Cin, H, W = x.shape
    Chid = params["w1"].shape[0]
    Cout = params["w2"].shape[0]
    if use_res:
        assert stride == 1 and Cin == Cout

    # fixed_padding (identical to the PyTorch module)
    k_eff = 3 + 2 * (dilation - 1)
    pad_total = k_eff - 1
    pad_beg = pad_total // 2
    pad_end = pad_total - pad_beg
    Hp, Wp = H + pad_total, W + pad_total
    H_out = (Hp - k_eff) // stride + 1
    W_out = (Wp - k_eff) // stride + 1

    # Flat, lane-dense geometry.
    Lout = _round_up(H_out * Wp, 128)            # lane-dense output slab (row pitch Wp)
    s_max = 2 * dilation * (Wp + 1)              # largest depthwise tap offset
    r0 = pad_beg * (Wp + 1)                      # residual offset into padded flat input
    Lin = max(Hp * Wp, s_max + stride * (Lout - 1) + 1)
    if use_res:
        Lin = max(Lin, r0 + Lout)
    Lin = _round_up(Lin, 128)

    x_pad = jnp.pad(x, ((0, 0), (0, 0), (pad_beg, pad_end), (pad_beg, pad_end)))
    x_flat = x_pad.reshape(N, Cin, Hp * Wp)
    x_flat = jnp.pad(x_flat, ((0, 0), (0, 0), (0, Lin - Hp * Wp)))   # zero-extend

    # Fold BatchNorm (inference) scales into the conv weights on the host.
    w1f = params["w1"] * params["s1"][:, None]                       # (Chid, Cin)
    b1f = params["b1"][:, None]                                      # (Chid, 1)
    wdf = (params["wd"] * params["s2"][None, None, :]).reshape(9, Chid).T  # (Chid, 9)
    b2f = params["b2"][:, None]                                      # (Chid, 1)
    w2f = params["w2"] * params["s3"][:, None]                       # (Cout, Chid)
    b3f = params["b3"][:, None]                                      # (Cout, 1)

    kernel = functools.partial(_inverted_residual_kernel,
                               stride, dilation, Wp, r0, use_res)

    in_specs = [
        pl.BlockSpec((1, Cin, Lin), lambda n: (n, 0, 0)),
        pl.BlockSpec((Chid, Cin), lambda n: (0, 0)),
        pl.BlockSpec((Chid, 1), lambda n: (0, 0)),
        pl.BlockSpec((Chid, 9), lambda n: (0, 0)),
        pl.BlockSpec((Chid, 1), lambda n: (0, 0)),
        pl.BlockSpec((Cout, Chid), lambda n: (0, 0)),
        pl.BlockSpec((Cout, 1), lambda n: (0, 0)),
    ]
    out_spec = pl.BlockSpec((1, Cout, Lout), lambda n: (n, 0, 0))

    out_flat = pl.pallas_call(
        kernel,
        grid=(N,),
        in_specs=in_specs,
        out_specs=out_spec,
        out_shape=jax.ShapeDtypeStruct((N, Cout, Lout), x.dtype),
        compiler_params=pltpu.CompilerParams(
            dimension_semantics=("parallel",)),   # one image per TensorCore on v7x
    )(x_flat, w1f, b1f, wdf, b2f, w2f, b3f)

    # Extract the valid (H_out, W_out) pixels from the lane-dense flat slab.
    out = out_flat[:, :, :H_out * Wp].reshape(N, Cout, H_out, Wp)[:, :, :, :W_out]
    return out


# ----------------------------------------------------------------------------- reference (plain JAX, NCHW)
def reference(x, params, stride, dilation, use_res):
    k_eff = 3 + 2 * (dilation - 1)
    pad_total = k_eff - 1
    pad_beg = pad_total // 2
    pad_end = pad_total - pad_beg
    x_pad = jnp.pad(x, ((0, 0), (0, 0), (pad_beg, pad_end), (pad_beg, pad_end)))

    def bn(t, s, b):
        return t * s[None, :, None, None] + b[None, :, None, None]

    h1 = jnp.einsum("nchw,dc->ndhw", x_pad, params["w1"])
    h1 = jnp.clip(bn(h1, params["s1"], params["b1"]), 0.0, 6.0)

    chid = h1.shape[1]
    wd = params["wd"].reshape(3, 3, 1, chid)
    h2 = lax.conv_general_dilated(
        h1, wd, window_strides=(stride, stride), padding="VALID",
        rhs_dilation=(dilation, dilation),
        dimension_numbers=("NCHW", "HWIO", "NCHW"),
        feature_group_count=chid)
    h2 = jnp.clip(bn(h2, params["s2"], params["b2"]), 0.0, 6.0)

    out = jnp.einsum("nchw,dc->ndhw", h2, params["w2"])
    out = bn(out, params["s3"], params["b3"])
    if use_res:
        out = out + x
    return out


def make_bn(key, c, eps=1e-5):
    kg, kb, km, kv = jax.random.split(key, 4)
    gamma = jax.random.uniform(kg, (c,), jnp.float32, 0.5, 1.5)
    beta = jax.random.normal(kb, (c,), jnp.float32) * 0.1
    mean = jax.random.normal(km, (c,), jnp.float32) * 0.1
    var = jax.random.uniform(kv, (c,), jnp.float32, 0.5, 1.5)
    scale = gamma / jnp.sqrt(var + eps)
    bias = beta - mean * scale
    return scale, bias


# ----------------------------------------------------------------------------- main
if __name__ == "__main__":
    # Module hyper-parameters: InvertedResidual(inp=4, oup=4, stride=1,
    # dilation=1, expand_ratio=6, batch_norm=nn.BatchNorm2d)  (inference-mode BN)
    inp, oup = 4, 4
    stride, dilation, expand_ratio = 1, 1, 6
    hidden = round(inp * expand_ratio)                  # 24
    use_res = (stride == 1 and inp == oup)              # True

    key = jax.random.PRNGKey(0)
    keys = jax.random.split(key, 7)
    # NCHW input, same layout as the PyTorch module: (2, 4, 16, 16).
    x = jax.random.normal(keys[0], (2, inp, 16, 16), jnp.float32)

    w1 = jax.random.normal(keys[1], (hidden, inp), jnp.float32) * 0.1    # 1x1 expand
    wd = jax.random.normal(keys[2], (3, 3, hidden), jnp.float32) * 0.1   # 3x3 depthwise
    w2 = jax.random.normal(keys[3], (oup, hidden), jnp.float32) * 0.1    # 1x1 project
    s1, b1 = make_bn(keys[4], hidden)
    s2, b2 = make_bn(keys[5], hidden)
    s3, b3 = make_bn(keys[6], oup)

    params = dict(w1=w1, s1=s1, b1=b1, wd=wd, s2=s2, b2=b2,
                  w2=w2, s3=s3, b3=b3)

    out = inverted_residual(x, params, stride=stride, dilation=dilation,
                            use_res=use_res)
    out = jax.block_until_ready(out)

    ref = reference(x, params, stride, dilation, use_res)
    assert out.shape == ref.shape, (out.shape, ref.shape)
    assert jnp.allclose(out, ref, atol=1e-4, rtol=1e-4), \
        float(jnp.max(jnp.abs(out - ref)))

    print("KERNEL_OK")
</pallas_src>

<mosaic_0001>
module attributes {stable_mosaic.version = 11 : i64} {
  func.func @_inverted_residual_kernel(%arg0: i32, %arg1: memref<1x4x512xf32, #tpu.memory_space<vmem>>, %arg2: memref<24x4xf32, #tpu.memory_space<vmem>>, %arg3: memref<24x1xf32, #tpu.memory_space<vmem>>, %arg4: memref<24x9xf32, #tpu.memory_space<vmem>>, %arg5: memref<24x1xf32, #tpu.memory_space<vmem>>, %arg6: memref<4x24xf32, #tpu.memory_space<vmem>>, %arg7: memref<4x1xf32, #tpu.memory_space<vmem>>, %arg8: memref<1x4x384xf32, #tpu.memory_space<vmem>>) attributes {dimension_semantics = [#tpu.dimension_semantics<parallel>], iteration_bounds = array<i64: 2>, scalar_prefetch = 0 : i64, scratch_operands = 0 : i64, tpu.core_type = #tpu.core_type<tc>, window_params = [{transform_indices = @transform_0, window_bounds = array<i64: 1, 4, 512>}, {pipeline_mode = #tpu.pipeline_mode<synchronous>, transform_indices = @transform_1, window_bounds = array<i64: 24, 4>}, {pipeline_mode = #tpu.pipeline_mode<synchronous>, transform_indices = @transform_2, window_bounds = array<i64: 24, 1>}, {pipeline_mode = #tpu.pipeline_mode<synchronous>, transform_indices = @transform_3, window_bounds = array<i64: 24, 9>}, {pipeline_mode = #tpu.pipeline_mode<synchronous>, transform_indices = @transform_4, window_bounds = array<i64: 24, 1>}, {pipeline_mode = #tpu.pipeline_mode<synchronous>, transform_indices = @transform_5, window_bounds = array<i64: 4, 24>}, {pipeline_mode = #tpu.pipeline_mode<synchronous>, transform_indices = @transform_6, window_bounds = array<i64: 4, 1>}, {transform_indices = @transform_7, window_bounds = array<i64: 1, 4, 384>}]} {
    %c0 = arith.constant 0 : index
    %c0_0 = arith.constant 0 : index
    %c0_1 = arith.constant 0 : index
    %0 = vector.load %arg1[%c0, %c0_0, %c0_1] : memref<1x4x512xf32, #tpu.memory_space<vmem>>, vector<1x4x512xf32>
    %1 = vector.shape_cast %0 : vector<1x4x512xf32> to vector<4x512xf32>
    %c0_2 = arith.constant 0 : index
    %c0_3 = arith.constant 0 : index
    %2 = vector.load %arg2[%c0_2, %c0_3] : memref<24x4xf32, #tpu.memory_space<vmem>>, vector<24x4xf32>
    %cst = arith.constant dense<0.000000e+00> : vector<24x512xf32>
    %3 = tpu.matmul %2, %1, %cst {dimension_numbers = #tpu.dot_dimension_numbers<[1], [0], [0], [1], [0, 0, 1, 1], [], []>} : vector<24x4xf32>, vector<4x512xf32>, vector<24x512xf32> -> vector<24x512xf32>
    %c0_4 = arith.constant 0 : index
    %c0_5 = arith.constant 0 : index
    %4 = vector.load %arg3[%c0_4, %c0_5] : memref<24x1xf32, #tpu.memory_space<vmem>>, vector<24x1xf32>
    %5 = vector.broadcast %4 : vector<24x1xf32> to vector<24x512xf32>
    %6 = arith.addf %3, %5 : vector<24x512xf32>
    %cst_6 = arith.constant 0.000000e+00 : f32
    %cst_7 = arith.constant 6.000000e+00 : f32
    %7 = vector.broadcast %cst_6 : f32 to vector<24x512xf32>
    %8 = arith.maximumf %7, %6 : vector<24x512xf32>
    %9 = vector.broadcast %cst_7 : f32 to vector<24x512xf32>
    %10 = arith.minimumf %9, %8 : vector<24x512xf32>
    %11 = vector.extract_strided_slice %10 {offsets = [0, 0], sizes = [24, 384], strides = [1, 1]} : vector<24x512xf32> to vector<24x384xf32>
    %c0_8 = arith.constant 0 : index
    %c0_9 = arith.constant 0 : index
    %12 = vector.load %arg4[%c0_8, %c0_9] : memref<24x9xf32, #tpu.memory_space<vmem>>, vector<24x1xf32>
    %13 = vector.broadcast %12 : vector<24x1xf32> to vector<24x384xf32>
    %14 = arith.mulf %11, %13 : vector<24x384xf32>
    %15 = vector.extract_strided_slice %10 {offsets = [0, 1], sizes = [24, 384], strides = [1, 1]} : vector<24x512xf32> to vector<24x384xf32>
    %c0_10 = arith.constant 0 : index
    %c1 = arith.constant 1 : index
    %16 = vector.load %arg4[%c0_10, %c1] : memref<24x9xf32, #tpu.memory_space<vmem>>, vector<24x1xf32>
    %17 = vector.broadcast %16 : vector<24x1xf32> to vector<24x384xf32>
    %18 = arith.mulf %15, %17 : vector<24x384xf32>
    %19 = arith.addf %14, %18 : vector<24x384xf32>
    %20 = vector.extract_strided_slice %10 {offsets = [0, 2], sizes = [24, 384], strides = [1, 1]} : vector<24x512xf32> to vector<24x384xf32>
    %c0_11 = arith.constant 0 : index
    %c2 = arith.constant 2 : index
    %21 = vector.load %arg4[%c0_11, %c2] : memref<24x9xf32, #tpu.memory_space<vmem>>, vector<24x1xf32>
    %22 = vector.broadcast %21 : vector<24x1xf32> to vector<24x384xf32>
    %23 = arith.mulf %20, %22 : vector<24x384xf32>
    %24 = arith.addf %19, %23 : vector<24x384xf32>
    %25 = vector.extract_strided_slice %10 {offsets = [0, 18], sizes = [24, 384], strides = [1, 1]} : vector<24x512xf32> to vector<24x384xf32>
    %c0_12 = arith.constant 0 : index
    %c3 = arith.constant 3 : index
    %26 = vector.load %arg4[%c0_12, %c3] : memref<24x9xf32, #tpu.memory_space<vmem>>, vector<24x1xf32>
    %27 = vector.broadcast %26 : vector<24x1xf32> to vector<24x384xf32>
    %28 = arith.mulf %25, %27 : vector<24x384xf32>
    %29 = arith.addf %24, %28 : vector<24x384xf32>
    %30 = vector.extract_strided_slice %10 {offsets = [0, 19], sizes = [24, 384], strides = [1, 1]} : vector<24x512xf32> to vector<24x384xf32>
    %c0_13 = arith.constant 0 : index
    %c4 = arith.constant 4 : index
    %31 = vector.load %arg4[%c0_13, %c4] : memref<24x9xf32, #tpu.memory_space<vmem>>, vector<24x1xf32>
    %32 = vector.broadcast %31 : vector<24x1xf32> to vector<24x384xf32>
    %33 = arith.mulf %30, %32 : vector<24x384xf32>
    %34 = arith.addf %29, %33 : vector<24x384xf32>
    %35 = vector.extract_strided_slice %10 {offsets = [0, 20], sizes = [24, 384], strides = [1, 1]} : vector<24x512xf32> to vector<24x384xf32>
    %c0_14 = arith.constant 0 : index
    %c5 = arith.constant 5 : index
    %36 = vector.load %arg4[%c0_14, %c5] : memref<24x9xf32, #tpu.memory_space<vmem>>, vector<24x1xf32>
    %37 = vector.broadcast %36 : vector<24x1xf32> to vector<24x384xf32>
    %38 = arith.mulf %35, %37 : vector<24x384xf32>
    %39 = arith.addf %34, %38 : vector<24x384xf32>
    %40 = vector.extract_strided_slice %10 {offsets = [0, 36], sizes = [24, 384], strides = [1, 1]} : vector<24x512xf32> to vector<24x384xf32>
    %c0_15 = arith.constant 0 : index
    %c6 = arith.constant 6 : index
    %41 = vector.load %arg4[%c0_15, %c6] : memref<24x9xf32, #tpu.memory_space<vmem>>, vector<24x1xf32>
    %42 = vector.broadcast %41 : vector<24x1xf32> to vector<24x384xf32>
    %43 = arith.mulf %40, %42 : vector<24x384xf32>
    %44 = arith.addf %39, %43 : vector<24x384xf32>
    %45 = vector.extract_strided_slice %10 {offsets = [0, 37], sizes = [24, 384], strides = [1, 1]} : vector<24x512xf32> to vector<24x384xf32>
    %c0_16 = arith.constant 0 : index
    %c7 = arith.constant 7 : index
    %46 = vector.load %arg4[%c0_16, %c7] : memref<24x9xf32, #tpu.memory_space<vmem>>, vector<24x1xf32>
    %47 = vector.broadcast %46 : vector<24x1xf32> to vector<24x384xf32>
    %48 = arith.mulf %45, %47 : vector<24x384xf32>
    %49 = arith.addf %44, %48 : vector<24x384xf32>
    %50 = vector.extract_strided_slice %10 {offsets = [0, 38], sizes = [24, 384], strides = [1, 1]} : vector<24x512xf32> to vector<24x384xf32>
    %c0_17 = arith.constant 0 : index
    %c8 = arith.constant 8 : index
    %51 = vector.load %arg4[%c0_17, %c8] : memref<24x9xf32, #tpu.memory_space<vmem>>, vector<24x1xf32>
    %52 = vector.broadcast %51 : vector<24x1xf32> to vector<24x384xf32>
    %53 = arith.mulf %50, %52 : vector<24x384xf32>
    %54 = arith.addf %49, %53 : vector<24x384xf32>
    %c0_18 = arith.constant 0 : index
    %c0_19 = arith.constant 0 : index
    %55 = vector.load %arg5[%c0_18, %c0_19] : memref<24x1xf32, #tpu.memory_space<vmem>>, vector<24x1xf32>
    %56 = vector.broadcast %55 : vector<24x1xf32> to vector<24x384xf32>
    %57 = arith.addf %54, %56 : vector<24x384xf32>
    %cst_20 = arith.constant 0.000000e+00 : f32
    %cst_21 = arith.constant 6.000000e+00 : f32
    %58 = vector.broadcast %cst_20 : f32 to vector<24x384xf32>
    %59 = arith.maximumf %58, %57 : vector<24x384xf32>
    %60 = vector.broadcast %cst_21 : f32 to vector<24x384xf32>
    %61 = arith.minimumf %60, %59 : vector<24x384xf32>
    %c0_22 = arith.constant 0 : index
    %c0_23 = arith.constant 0 : index
    %62 = vector.load %arg6[%c0_22, %c0_23] : memref<4x24xf32, #tpu.memory_space<vmem>>, vector<4x24xf32>
    %cst_24 = arith.constant dense<0.000000e+00> : vector<4x384xf32>
    %63 = tpu.matmul %62, %61, %cst_24 {dimension_numbers = #tpu.dot_dimension_numbers<[1], [0], [0], [1], [0, 0, 1, 1], [], []>} : vector<4x24xf32>, vector<24x384xf32>, vector<4x384xf32> -> vector<4x384xf32>
    %c0_25 = arith.constant 0 : index
    %c0_26 = arith.constant 0 : index
    %64 = vector.load %arg7[%c0_25, %c0_26] : memref<4x1xf32, #tpu.memory_space<vmem>>, vector<4x1xf32>
    %65 = vector.broadcast %64 : vector<4x1xf32> to vector<4x384xf32>
    %66 = arith.addf %63, %65 : vector<4x384xf32>
    %67 = vector.extract_strided_slice %1 {offsets = [0, 19], sizes = [4, 384], strides = [1, 1]} : vector<4x512xf32> to vector<4x384xf32>
    %68 = arith.addf %66, %67 : vector<4x384xf32>
    %c0_27 = arith.constant 0 : index
    %c0_28 = arith.constant 0 : index
    %c0_29 = arith.constant 0 : index
    %69 = vector.load %arg8[%c0_27, %c0_28, %c0_29] : memref<1x4x384xf32, #tpu.memory_space<vmem>>, vector<1x4x384xf32>
    %70 = vector.shape_cast %69 : vector<1x4x384xf32> to vector<4x384xf32>
    %71 = vector.shape_cast %68 : vector<4x384xf32> to vector<1x4x384xf32>
    tpu.vector_store %arg8[%c0_27, %c0_28, %c0_29], %71 {strides = array<i32>} : memref<1x4x384xf32, #tpu.memory_space<vmem>>, vector<1x4x384xf32>,
    return
  }
  func.func @transform_0(%arg0: i32) -> (i32, i32, i32) {
    %c0_i32 = arith.constant 0 : i32
    %c0_i32_0 = arith.constant 0 : i32
    %c0_i32_1 = arith.constant 0 : i32
    return %arg0, %c0_i32, %c0_i32_0 : i32, i32, i32
  }
  func.func @transform_1(%arg0: i32) -> (i32, i32) {
    %c0_i32 = arith.constant 0 : i32
    %c0_i32_0 = arith.constant 0 : i32
    %c0_i32_1 = arith.constant 0 : i32
    return %c0_i32, %c0_i32_0 : i32, i32
  }
  func.func @transform_2(%arg0: i32) -> (i32, i32) {
    %c0_i32 = arith.constant 0 : i32
    %c0_i32_0 = arith.constant 0 : i32
    %c0_i32_1 = arith.constant 0 : i32
    return %c0_i32, %c0_i32_0 : i32, i32
  }
  func.func @transform_3(%arg0: i32) -> (i32, i32) {
    %c0_i32 = arith.constant 0 : i32
    %c0_i32_0 = arith.constant 0 : i32
    %c0_i32_1 = arith.constant 0 : i32
    return %c0_i32, %c0_i32_0 : i32, i32
  }
  func.func @transform_4(%arg0: i32) -> (i32, i32) {
    %c0_i32 = arith.constant 0 : i32
    %c0_i32_0 = arith.constant 0 : i32
    %c0_i32_1 = arith.constant 0 : i32
    return %c0_i32, %c0_i32_0 : i32, i32
  }
  func.func @transform_5(%arg0: i32) -> (i32, i32) {
    %c0_i32 = arith.constant 0 : i32
    %c0_i32_0 = arith.constant 0 : i32
    %c0_i32_1 = arith.constant 0 : i32
    return %c0_i32, %c0_i32_0 : i32, i32
  }
  func.func @transform_6(%arg0: i32) -> (i32, i32) {
    %c0_i32 = arith.constant 0 : i32
    %c0_i32_0 = arith.constant 0 : i32
    %c0_i32_1 = arith.constant 0 : i32
    return %c0_i32, %c0_i32_0 : i32, i32
  }
  func.func @transform_7(%arg0: i32) -> (i32, i32, i32) {
    %c0_i32 = arith.constant 0 : i32
    %c0_i32_0 = arith.constant 0 : i32
    %c0_i32_1 = arith.constant 0 : i32
    return %arg0, %c0_i32, %c0_i32_0 : i32, i32, i32
  }
}

</mosaic_0001>

<bundles_post_ra>
// kernel: tpu_custom_call.1
= control target key start
LH: loop header
LB: loop body
LE: loop exit
PB: predicated region body
PF: predicated region fallthrough
CT: control target
= control target key end

     0   :  { %12 = vsyncpa [#allocation3], 0  ;;  %s2292_s0 = inlined_call_operand.vmem [shape: f32[2,4,512], index: 0, kind: input, shape index: {}]   ;;  %s2293_s1 = inlined_call_operand.vmem [shape: f32[24,4], index: 1, kind: input, shape index: {}]   ;;  %s2294_s2 = inlined_call_operand.vmem [shape: f32[24,1], index: 2, kind: input, shape index: {}]   ;;  %s2295_s3 = inlined_call_operand.vmem [shape: f32[24,9], index: 3, kind: input, shape index: {}]   ;;  %s2296_s4 = inlined_call_operand.vmem [shape: f32[24,1], index: 4, kind: input, shape index: {}]   ;;  %s2297_s5 = inlined_call_operand.vmem [shape: f32[4,24], index: 5, kind: input, shape index: {}]   ;;  %s2298_s6 = inlined_call_operand.vmem [shape: f32[4,1], index: 6, kind: input, shape index: {}]   ;;  %s2299_s7 = inlined_call_operand.hbm [shape: f32[2,4,384], index: 7, kind: output, shape index: {}]  }
   0x1   :  { %14 = vsyncpa [#allocation3 + $0x1], 0  ;;  %s1646_s24 = smov 0   ;;  %s1648_s25 = smov 0  }
   0x2   :  { %s1650_s26 = smov 0   ;;  %s1652_s27 = smov 0  }
   0x3 LB: > { %s1667_s28 = sadd.s32 4294967295, %s1587_s27   ;;  %s1410_s29 = sadd.s32 4294967294, %s1587_s27   ;;  %s1587_s27 = sphi %s1652_s27, %s2305_s27   ;;  %s1583_s26 = sphi %s1650_s26, %s2304_s26   ;;  %s1579_s25 = sphi %s1648_s25, %s2303_s25   ;;  %s1575_s24 = sphi %s1646_s24, %s2302_s24  }
   0x4   : > { %s1671_s30 = sadd.s32 1, %s1587_s27   ;;  %s179_s8 = sadd.s32 1, %s1583_s26 }
   0x5   : > { %s176_s9 = ssub.s32 %s1587_s27, %s1671_s30  ;;  %p189_p0 = scmp.ne.s32.totalorder %s1583_s26, %s1579_s25 }
   0x6   : > { %p177_p1 = scmp.eq.s32.totalorder %s176_s9, 0  ;;  %p190_p2 = scmp.eq.s32.totalorder %s1667_s28, 1 }
   0x7   : > { %p195_p3 = scmp.ne.s32.totalorder %s1579_s25, %s1575_s24  ;;  %p196_p4 = scmp.eq.s32.totalorder %s1410_s29, 1 }
   0x8   : > { %s1682_s10 = scalar_select %p177_p1, %s1583_s26, %s179_s8  }
   0x9   : > { %p1684_p5 = por %p190_p2, %p189_p0  ;;  %p1688_p6 = por %p196_p4, %p195_p3 }
   0xa   : > { %p1413_p7 = scmp.ge.s32.totalorder %s1587_s27, 1  ;;  %p240_p8 = scmp.lt.s32.totalorder %s1587_s27, 3 }
   0xc   : > { %p241_p9 = pnand %p1413_p7, %p240_p8 }
   0xd   : > { %p272_p10 = scmp.lt.s32.totalorder (!%p241_p9), %s1667_s28, 1  ;;  %s1594_s22 = smov (!%p241_p9), 127  }
   0xe   : > { %244 = sbr.rel (%p241_p9) target bundleno = 810 (0x32a), region = 48  ;;  %s1596_s29 = smov (!%p241_p9), 110  }
   0xf   : > { %s1597_s8 = smov (!%p241_p9), 109   ;;  %s1602_s9 = smov (!%p241_p9), 108  }
  0x10   : > { %s1603_s13 = smov (!%p241_p9), 92   ;;  %s1604_s14 = smov (!%p241_p9), 91  }
  0x11   : > { %s1605_s15 = smov (!%p241_p9), 90  }
  0x13   : > { %v284_v0 = vld [vmem:[%s2294_s2 + $0x10] sm:$0xff]  ;;  %v282_v1 = vld [vmem:[%s2294_s2] sm:$0xff]  ;;  %v1589_v2 = vmov 0   ;;  %s273_s17 = scalar_select %p272_p10, %s1667_s28, 1  ;;  %v1707_v3 = vld [vmem:[%s2295_s3 + $0x8] sm:$0xff]  ;;  %vm319_vm0 = vcmask 1043456  }
  0x14   : > { %1498 = vset.pattern.permute.xlu1 %v1589_v2  ;;  %1497 = vset.pattern.permute.xlu0 %v1589_v2  ;;  %v1717_v6 = vld [vmem:[%s2295_s3] sm:$0xff]  ;;  %v283_v7 = vld [vmem:[%s2294_s2 + $0x8] sm:$0xff]  ;;  %v1726_v8 = vld [vmem:[%s2295_s3 + $0x10] sm:$0xff]  ;;  %vm309_vm1 = vcmask 31744   ;;  %v1590_v14 = vmov 1   ;;  %v1591_v16 = vmov 2  }
  0x15   : > { %297 = vperm.xlu1 %1498, %v284_v0   ;;  %287 = vperm.xlu0 %1497, %v282_v1   ;;  %s1438_s20 = sshll.u32 %s273_s17, 4  ;;  %v279_v9 = vld [vmem:[%s2293_s1] sm:$0xff]  ;;  %v280_v15 = vld [vmem:[%s2293_s1 + $0x8] sm:$0xff]  ;;  %v281_v17 = vld [vmem:[%s2293_s1 + $0x10] sm:$0xff]  ;;  %v1592_v18 = vmov 3   ;;  %v1593_v19 = vmov 4  }
  0x16   : > { %1499 = vset.pattern.permute.xlu2 %v1589_v2  ;;  %s276_s23 = scalar_lea.vmem %s2292_s0, %s1438_s20  ;;  %vm543_vm2 = vcmask 1039360   ;;  %vm631_vm3 = vcmask 1031168   ;;  %vm719_vm4 = vcmask 900096   ;;  %vm807_vm5 = vcmask 891904  }
  0x17   : > { %466 = vperm.xlu2 %1499, %v1707_v3   ;;  %v277_v4 = vld [vmem:[%s276_s23] sm:$0xff]  ;;  %v278_v5 = vld [vmem:[%s276_s23 + $0x8] sm:$0xff]  ;;  %s1595_s23 = smov 126   ;;  %vm895_vm6 = vcmask 883712   ;;  %vm983_vm7 = vcmask 752640   ;;  %vm1071_vm8 = vcmask 744448  }
  0x18   : > { %302 = vst [vmem:[#allocation1] ss:$2 sm:$0xff] %v277_v4  ;;  %vm1159_vm9 = vcmask 736256   ;;  %vm1239_vm10 = vcmask 195584  }
  0x19   : > { %304 = vst [vmem:[#allocation1 + $0x10] ss:$2 sm:$0xff] %v278_v5 }
  0x1d   : > { %461 = vperm.xlu1 %1498, %v1717_v6   ;;  %292 = vperm.xlu0 %1497, %v283_v7  }
  0x1f   : > { %471 = vperm.xlu2 %1499, %v1726_v8   ;;  %v305_v10 = vld.sshfl [vmem:[#allocation1] sm:$0xff pattern:$0x75316420]  ;;  %v306_v11 = vld.sshfl [vmem:[#allocation1 + $0x8] sm:$0xff pattern:$0x75316420] }
  0x20   : > { %1416 = vmatpush.msk.msra.mxu0 %vm319_vm0, %v305_v10  ;;  %1420 = vmatpush.msk.msra.mxu1 %vm319_vm0, %v306_v11  ;;  %1303 = vst [vmem:[#allocation1] ss:$2 sm:$0xff] %v277_v4  ;;  %v307_v12 = vld.sshfl [vmem:[#allocation1 + $0x10] sm:$0xff pattern:$0x75316420] }
  0x21   : > { %1424 = vmatpush.msk.msra.mxu2 %vm319_vm0, %v307_v12  ;;  %v308_v13 = vld.sshfl [vmem:[#allocation1 + $0x18] sm:$0xff pattern:$0x75316420]  ;;  %1417 = vmatmul.msk.f32.vlgmr.msra.gmra.mxu0 %vm309_vm1, %v279_v9 }
  0x22   : > { %1428 = vmatpush.msk.msra.mxu3 %vm319_vm0, %v308_v13  ;;  %1305 = vst [vmem:[#allocation1 + $0x10] ss:$2 sm:$0xff] %v278_v5  ;;  %1421 = vmatmul.msk.f32.vlgmr.msra.gmra.mxu1 %vm309_vm1, %v279_v9 }
  0x23   : > { %1425 = vmatmul.msk.f32.vlgmr.msra.gmra.mxu2 %vm309_vm1, %v279_v9  ;;  %1429 = vmatmul.msk.f32.vlgmr.msra.gmra.mxu3 %vm309_vm1, %v279_v9 }
  0x25   : > { %1501 = vset.pattern.permute.xlu1 %v1590_v14  ;;  %1500 = vset.pattern.permute.xlu0 %v1590_v14 }
  0x26   : > { %488 = vperm.xlu1 %1501, %v1707_v3   ;;  %484 = vperm.xlu0 %1500, %v1717_v6  }
  0x27   : > { %1502 = vset.pattern.permute.xlu2 %v1590_v14 }
  0x28   : > { %492 = vperm.xlu2 %1502, %v1726_v8  }
  0x29   : > { %1418 = vmatmul.msk.f32.gmra.mxu0 %vm309_vm1, %v280_v15 }
  0x2a   : > { %1422 = vmatmul.msk.f32.gmra.mxu1 %vm309_vm1, %v280_v15 }
  0x2b   : > { %1426 = vmatmul.msk.f32.gmra.mxu2 %vm309_vm1, %v280_v15  ;;  %1430 = vmatmul.msk.f32.gmra.mxu3 %vm309_vm1, %v280_v15 }
  0x2e   : > { %1503 = vset.pattern.permute.xlu1 %v1591_v16  ;;  %1505 = vset.pattern.permute.xlu0 %v1591_v16 }
  0x2f   : > { %572 = vperm.xlu1 %1503, %v1717_v6   ;;  %580 = vperm.xlu0 %1505, %v1726_v8  }
  0x30   : > { %1504 = vset.pattern.permute.xlu2 %v1591_v16 }
  0x31   : > { %576 = vperm.xlu2 %1504, %v1707_v3   ;;  %1419 = vmatmul.msk.f32.gmra.mxu0 %vm309_vm1, %v281_v17 }
  0x32   : > { %1423 = vmatmul.msk.f32.gmra.mxu1 %vm309_vm1, %v281_v17 }
  0x33   : > { %1427 = vmatmul.msk.f32.gmra.mxu2 %vm309_vm1, %v281_v17  ;;  %1431 = vmatmul.msk.f32.gmra.mxu3 %vm309_vm1, %v281_v17 }
  0x37   : > { %1508 = vset.pattern.permute.xlu1 %v1592_v18  ;;  %1507 = vset.pattern.permute.xlu0 %v1592_v18 }
  0x38   : > { %668 = vperm.xlu1 %1508, %v1726_v8   ;;  %664 = vperm.xlu0 %1507, %v1707_v3  }
  0x39   : > { %1506 = vset.pattern.permute.xlu2 %v1592_v18 }
  0x3a   : > { %660 = vperm.xlu2 %1506, %v1717_v6  }
  0x40   : > { %1510 = vset.pattern.permute.xlu1 %v1593_v19  ;;  %1509 = vset.pattern.permute.xlu0 %v1593_v19 }
  0x41   : > { %752 = vperm.xlu1 %1510, %v1707_v3   ;;  %748 = vperm.xlu0 %1509, %v1717_v6  }
  0x42   : > { %1511 = vset.pattern.permute.xlu2 %v1593_v19 }
  0x43   : > { %756 = vperm.xlu2 %1511, %v1726_v8  }
  0x71   : > { %v1766_v21 = vpop.permute.xlu2 %466 }
  0x79   : > { %v1772_v24 = vpop.permute.xlu2 %471 }
  0x82   : > { %v1776_v27 = vpop.permute.xlu2 %492 }
  0x87   : > { %v288_v20 = vpop.permute.xlu0 %287  ;;  %v1768_v22 = vpop.permute.xlu1 %297 }
  0x8b   : > { %v1789_v43 = vpop.permute.xlu2 %576 }
  0x8f   : > { %v1770_v23 = vpop.permute.xlu0 %292  ;;  %v1774_v25 = vpop.permute.xlu1 %461 }
  0x94   : > { %v661_v54 = vpop.permute.xlu2 %660 }
  0x98   : > { %v485_v26 = vpop.permute.xlu0 %484  ;;  %v1778_v33 = vpop.permute.xlu1 %488 }
  0x9e   : > { %v345_v28 = vpop.f32.mrf.mxu0 }
  0x9f   : > { %v346_v29 = vadd.f32 %v345_v28, %v288_v20  ;;  %v371_v30 = vpop.f32.mrf.mxu1 }
  0xa0   : > { %v372_v31 = vadd.f32 %v371_v30, %v288_v20 }
  0xa1   : > { %v432_v32 = vmax.f32 %v346_v29, 0.0  ;;  %v1784_v37 = vpop.permute.xlu0 %580  ;;  %v573_v47 = vpop.permute.xlu1 %572 }
  0xa2   : > { %v433_v34 = vmax.f32 %v372_v31, 0.0 }
  0xa3   : > { %v1780_v35 = vmin.f32 %v432_v32, 6.0 }
  0xa4   : > { %v1782_v36 = vmin.f32 %v433_v34, 6.0 }
  0xa5   : > { %v495_v38 = vmul.f32 %v485_v26, %v1780_v35  ;;  %v583_v50 = vmul.f32 %v573_v47, %v1780_v35  ;;  %v671_v58 = vmul.f32 %v661_v54, %v1780_v35 }
  0xa6   : > { %v397_v39 = vpop.f32.mrf.mxu2  ;;  %v423_v40 = vpop.f32.mrf.mxu3  ;;  %v496_v41 = vmul.f32 %v485_v26, %v1782_v36  ;;  %v584_v51 = vmul.f32 %v573_v47, %v1782_v36  ;;  %v672_v56 = vmul.f32 %v661_v54, %v1782_v36 }
  0xa7   : > { %v398_v42 = vadd.f32 %v397_v39, %v288_v20  ;;  %519 = vrot.lane.b32.xlu1 %v495_v38, %s1594_s22  ;;  %v424_v45 = vadd.f32 %v423_v40, %v288_v20  ;;  %v374_v57 = vpop.f32.mrf.mxu1  ;;  %v348_v0 = vpop.f32.mrf.mxu0 }
  0xa8   : > { %521 = vrot.lane.b32.xlu2 %v496_v41, %s1594_s22  ;;  %v375_v59 = vadd.f32 %v374_v57, %v1770_v23  ;;  %v349_v4 = vadd.f32 %v348_v0, %v1770_v23 }
  0xa9   : > { %v434_v44 = vmax.f32 %v398_v42, 0.0  ;;  %v435_v48 = vmax.f32 %v424_v45, 0.0 }
  0xaa   : > { %v1799_v52 = vpop.permute.xlu0 %664  ;;  %v437_v61 = vmax.f32 %v375_v59, 0.0  ;;  %v436_v7 = vmax.f32 %v349_v4, 0.0  ;;  %v1826_v12 = vpop.permute.xlu1 %668 }
  0xab   : > { %v1792_v46 = vmin.f32 %v434_v44, 6.0  ;;  %v1802_v53 = vmin.f32 %v435_v48, 6.0 }
  0xac   : > { %v1818_v5 = vmin.f32 %v437_v61, 6.0  ;;  %v1829_v13 = vmin.f32 %v436_v7, 6.0  ;;  %v757_v7 = vpop.permute.xlu2 %756 }
  0xad   : > { %v497_v49 = vmul.f32 %v485_v26, %v1792_v46  ;;  %v674_v55 = vmul.f32 %v661_v54, %v1802_v53  ;;  %v498_v10 = vmul.f32 %v485_v26, %v1802_v53  ;;  %v586_v11 = vmul.f32 %v573_v47, %v1802_v53 }
  0xae   : > { %v500_v9 = vmul.f32 %v1778_v33, %v1818_v5  ;;  %v587_v14 = vmul.f32 %v1789_v43, %v1829_v13  ;;  %v585_v15 = vmul.f32 %v573_v47, %v1792_v46  ;;  %v426_v16 = vpop.f32.mrf.mxu3  ;;  %v673_v17 = vmul.f32 %v661_v54, %v1792_v46  ;;  %v400_v29 = vpop.f32.mrf.mxu2 }
  0xaf   : > { %523 = vrot.lane.b32.xlu0 %v497_v49, %s1594_s22  ;;  %607 = vrot.lane.b32.xlu1 %v583_v50, %s1595_s23  ;;  %v427_v18 = vadd.f32 %v426_v16, %v1770_v23  ;;  %v499_v30 = vmul.f32 %v1778_v33, %v1829_v13  ;;  %v401_v31 = vadd.f32 %v400_v29, %v1770_v23  ;;  %v351_v40 = vpop.f32.mrf.mxu0  ;;  %v377_v48 = vpop.f32.mrf.mxu1 }
  0xb0   : > { %609 = vrot.lane.b32.xlu2 %v584_v51, %s1595_s23  ;;  %v588_v39 = vmul.f32 %v1789_v43, %v1818_v5  ;;  %v676_v41 = vmul.f32 %v1799_v52, %v1818_v5  ;;  %v352_v42 = vadd.f32 %v351_v40, %v1768_v22  ;;  %v675_v47 = vmul.f32 %v1799_v52, %v1829_v13 }
  0xb1   : > { %v439_v20 = vmax.f32 %v427_v18, 0.0  ;;  %v438_v34 = vmax.f32 %v401_v31, 0.0  ;;  %v378_v51 = vadd.f32 %v377_v48, %v1768_v22 }
  0xb2   : > { %v440_v44 = vmax.f32 %v352_v42, 0.0 }
  0xb3   : > { %v749_v60 = vpop.permute.xlu0 %748  ;;  %v753_v19 = vpop.permute.xlu1 %752  ;;  %v1847_v32 = vmin.f32 %v439_v20, 6.0  ;;  %v1858_v23 = vmin.f32 %v438_v34, 6.0  ;;  %v441_v54 = vmax.f32 %v378_v51, 0.0 }
  0xb4   : > { %v761_v62 = vmul.f32 %v749_v60, %v1792_v46  ;;  %v759_v63 = vmul.f32 %v749_v60, %v1780_v35  ;;  %v760_v1 = vmul.f32 %v749_v60, %v1782_v36  ;;  %v764_v26 = vmul.f32 %v753_v19, %v1818_v5 }
  0xb5   : > { %v762_v28 = vmul.f32 %v749_v60, %v1802_v53  ;;  %v590_v38 = vmul.f32 %v1789_v43, %v1847_v32  ;;  %v677_v45 = vmul.f32 %v1799_v52, %v1858_v23  ;;  %v763_v49 = vmul.f32 %v753_v19, %v1829_v13 }
  0xb6   : > { %v1869_v50 = vmin.f32 %v440_v44, 6.0  ;;  %v429_v57 = vpop.f32.mrf.mxu3  ;;  %v1881_v59 = vmin.f32 %v441_v54, 6.0  ;;  %v403_v0 = vpop.f32.mrf.mxu2  ;;  %v475_v44 = vmul.f32 %v1774_v25, %v1782_v36 }
  0xb7   : > { %701 = vrot.lane.b32.xlu0 %v674_v55, %s1596_s29  ;;  %697 = vrot.lane.b32.xlu1 %v672_v56, %s1596_s29  ;;  %v501_v56 = vmul.f32 %v1778_v33, %v1858_v23  ;;  %v430_v60 = vadd.f32 %v429_v57, %v1768_v22 }
  0xb8   : > { %695 = vrot.lane.b32.xlu2 %v671_v58, %s1596_s29  ;;  %v503_v55 = vmul.f32 %v1776_v27, %v1869_v50  ;;  %v502_v58 = vmul.f32 %v1778_v33, %v1847_v32  ;;  %v589_v33 = vmul.f32 %v1789_v43, %v1858_v23  ;;  %v765_v43 = vmul.f32 %v753_v19, %v1858_v23 }
  0xb9   : > { %v443_v61 = vmax.f32 %v430_v60, 0.0  ;;  %v504_v16 = vmul.f32 %v1776_v27, %v1881_v59  ;;  %v591_v20 = vmul.f32 %v1784_v37, %v1869_v50  ;;  %v768_v54 = vmul.f32 %v757_v7, %v1881_v59 }
  0xbb   : > { %v1894_v4 = vmin.f32 %v443_v61, 6.0 }
  0xbd   : > { %v770_v29 = vmul.f32 %v757_v7, %v1894_v4 }
  0xbf   : > { %787 = vrot.lane.b32.xlu0 %v761_v62, %s1597_s8  ;;  %783 = vrot.lane.b32.xlu1 %v759_v63, %s1597_s8  ;;  %v680_v62 = vmul.f32 %v1826_v12, %v1881_v59  ;;  %v678_v63 = vmul.f32 %v1799_v52, %v1847_v32  ;;  %v506_v52 = vmul.f32 %v1776_v27, %v1894_v4 }
  0xc0   : > { %785 = vrot.lane.b32.xlu2 %v760_v1, %s1597_s8  ;;  %v404_v1 = vadd.f32 %v403_v0, %v1768_v22 }
  0xc7   : > { %529 = vrot.lane.b32.xlu0 %v500_v9, %s1594_s22  ;;  %525 = vrot.lane.b32.xlu1 %v498_v10, %s1594_s22  ;;  %v1598_v9 = vmov 5   ;;  %v442_v10 = vmax.f32 %v404_v1, 0.0 }
  0xc8   : > { %613 = vrot.lane.b32.xlu2 %v586_v11, %s1595_s23  ;;  %1514 = vset.pattern.permute.xlu0 %v1598_v9  ;;  %v766_v11 = vmul.f32 %v753_v19, %v1847_v32  ;;  %v767_v19 = vmul.f32 %v757_v7, %v1869_v50 }
  0xc9   : > { %1513 = vset.pattern.permute.xlu2 %v1598_v9  ;;  %1512 = vset.pattern.permute.xlu1 %v1598_v9  ;;  %v1903_v22 = vmin.f32 %v442_v10, 6.0 }
  0xcb   : > { %v505_v31 = vmul.f32 %v1776_v27, %v1903_v22  ;;  %v682_v27 = vmul.f32 %v1826_v12, %v1894_v4 }
  0xcf   : > { %615 = vrot.lane.b32.xlu0 %v587_v14, %s1595_s23  ;;  %611 = vrot.lane.b32.xlu1 %v585_v15, %s1595_s23  ;;  %v593_v15 = vmul.f32 %v1784_v37, %v1903_v22 }
  0xd0   : > { %699 = vrot.lane.b32.xlu2 %v673_v17, %s1596_s29  ;;  %v592_v17 = vmul.f32 %v1784_v37, %v1881_v59 }
  0xd7   : > { %793 = vrot.lane.b32.xlu0 %v764_v26, %s1597_s8  ;;  %789 = vrot.lane.b32.xlu1 %v762_v28, %s1597_s8  ;;  %v679_v26 = vmul.f32 %v1826_v12, %v1869_v50 }
  0xd8   : > { %527 = vrot.lane.b32.xlu2 %v499_v30, %s1594_s22  ;;  %v594_v30 = vmul.f32 %v1784_v37, %v1894_v4  ;;  %v681_v37 = vmul.f32 %v1826_v12, %v1903_v22 }
  0xdf   : > { %621 = vrot.lane.b32.xlu0 %v590_v38, %s1595_s23  ;;  %617 = vrot.lane.b32.xlu1 %v588_v39, %s1595_s23  ;;  %v474_v38 = vmul.f32 %v1774_v25, %v1780_v35 }
  0xe0   : > { %705 = vrot.lane.b32.xlu2 %v676_v41, %s1596_s29 }
  0xe7   : > { %707 = vrot.lane.b32.xlu0 %v677_v45, %s1596_s29  ;;  %703 = vrot.lane.b32.xlu1 %v675_v47, %s1596_s29 }
  0xe8   : > { %791 = vrot.lane.b32.xlu2 %v763_v49, %s1597_s8 }
  0xef   : > { %535 = vrot.lane.b32.xlu0 %v503_v55, %s1594_s22  ;;  %531 = vrot.lane.b32.xlu1 %v501_v56, %s1594_s22  ;;  %v769_v55 = vmul.f32 %v757_v7, %v1903_v22  ;;  %v1599_v56 = vmov 7  }
  0xf0   : > { %533 = vrot.lane.b32.xlu2 %v502_v58, %s1594_s22 }
  0xf7   : > { %713 = vrot.lane.b32.xlu0 %v680_v62, %s1596_s29  ;;  %709 = vrot.lane.b32.xlu1 %v678_v63, %s1596_s29 }
  0xf8   : > { %619 = vrot.lane.b32.xlu2 %v589_v33, %s1595_s23 }
  0xff   : > { %541 = vrot.lane.b32.xlu0 %v506_v52, %s1594_s22  ;;  %795 = vrot.lane.b32.xlu1 %v765_v43, %s1597_s8  ;;  %v1600_v43 = vmov 6  }
 0x100   : > { %797 = vrot.lane.b32.xlu2 %v766_v11, %s1597_s8 }
 0x102   : > { %v522_v14 = vpop.permute.xlu2 %521 }
 0x107   : > { %627 = vrot.lane.b32.xlu0 %v593_v15, %s1595_s23  ;;  %537 = vrot.lane.b32.xlu1 %v504_v16, %s1594_s22 }
 0x108   : > { %625 = vrot.lane.b32.xlu2 %v592_v17, %s1595_s23 }
 0x10a   : > { %v1914_v18 = vpop.permute.xlu2 %609 }
 0x10f   : > { %799 = vrot.lane.b32.xlu0 %v767_v19, %s1597_s8  ;;  %623 = vrot.lane.b32.xlu1 %v591_v20, %s1595_s23 }
 0x110   : > { %711 = vrot.lane.b32.xlu2 %v679_v26, %s1596_s29 }
 0x112   : > { %v696_v28 = vpop.permute.xlu2 %695 }
 0x117   : > { %805 = vrot.lane.b32.xlu0 %v770_v29, %s1597_s8  ;;  %629 = vrot.lane.b32.xlu1 %v594_v30, %s1595_s23 }
 0x118   : > { %539 = vrot.lane.b32.xlu2 %v505_v31, %s1594_s22 }
 0x119   : > { %v520_v34 = vpop.permute.xlu1 %519 }
 0x11a   : > { %v786_v39 = vpop.permute.xlu2 %785  ;;  %v544_v40 = vsel %vm543_vm2, %v520_v34, %v522_v14 }
 0x11b   : > { %v562_v41 = vadd.f32 %v544_v40, %v474_v38 }
 0x11f   : > { %844 = vperm.xlu0 %1514, %v1726_v8   ;;  %715 = vrot.lane.b32.xlu1 %v681_v37, %s1596_s29  ;;  %v1601_v37 = vmov 8  }
 0x120   : > { %717 = vrot.lane.b32.xlu2 %v682_v27, %s1596_s29 }
 0x121   : > { %v524_v42 = vpop.permute.xlu0 %523  ;;  %v608_v45 = vpop.permute.xlu1 %607 }
 0x122   : > { %v545_v47 = vsel %vm543_vm2, %v522_v14, %v524_v42  ;;  %v614_v48 = vpop.permute.xlu2 %613  ;;  %v632_v49 = vsel %vm631_vm3, %v608_v45, %v1914_v18  ;;  %v476_v14 = vmul.f32 %v1774_v25, %v1792_v46 }
 0x123   : > { %v563_v51 = vadd.f32 %v545_v47, %v475_v44  ;;  %v650_v12 = vadd.f32 %v632_v49, %v562_v41  ;;  %v477_v47 = vmul.f32 %v1766_v21, %v1829_v13 }
 0x127   : > { %1518 = vset.pattern.permute.xlu0 %v1599_v56  ;;  %801 = vrot.lane.b32.xlu1 %v768_v54, %s1597_s8 }
 0x128   : > { %1016 = vperm.xlu0 %1518, %v1707_v3   ;;  %803 = vrot.lane.b32.xlu2 %v769_v55, %s1597_s8 }
 0x129   : > { %v702_v57 = vpop.permute.xlu0 %701  ;;  %v698_v58 = vpop.permute.xlu1 %697 }
 0x12a   : > { %v700_v60 = vpop.permute.xlu2 %699  ;;  %v720_v61 = vsel %vm719_vm4, %v696_v28, %v698_v58 }
 0x12b   : > { %v722_v62 = vsel %vm719_vm4, %v700_v60, %v702_v57  ;;  %v721_v63 = vsel %vm719_vm4, %v698_v58, %v700_v60  ;;  %v738_v0 = vadd.f32 %v720_v61, %v650_v12 }
 0x12f   : > { %836 = vperm.xlu1 %1512, %v1717_v6  }
 0x130   : > { %840 = vperm.xlu2 %1513, %v1707_v3   ;;  %1523 = vset.pattern.permute.xlu0 %v1589_v2 }
 0x131   : > { %v788_v33 = vpop.permute.xlu0 %787  ;;  %v784_v1 = vpop.permute.xlu1 %783 }
 0x132   : > { %v809_v7 = vsel %vm807_vm5, %v786_v39, %v788_v33  ;;  %v528_v9 = vpop.permute.xlu2 %527  ;;  %v808_v10 = vsel %vm807_vm5, %v784_v1, %v786_v39 }
 0x133   : > { %v1960_v52 = vadd.f32 %v808_v10, %v738_v0 }
 0x137   : > { %1515 = vset.pattern.permute.xlu1 %v1600_v43 }
 0x138   : > { %1516 = vset.pattern.permute.xlu2 %v1600_v43  ;;  %932 = vperm.xlu1 %1515, %v1726_v8  }
 0x139   : > { %v530_v11 = vpop.permute.xlu0 %529  ;;  %928 = vperm.xlu2 %1516, %v1707_v3   ;;  %v526_v15 = vpop.permute.xlu1 %525 }
 0x13a   : > { %v547_v16 = vsel %vm543_vm2, %v528_v9, %v530_v11  ;;  %v706_v17 = vpop.permute.xlu2 %705  ;;  %v546_v19 = vsel %vm543_vm2, %v524_v42, %v526_v15 }
 0x13b   : > { %v564_v20 = vadd.f32 %v546_v19, %v476_v14 }
 0x140   : > { %1517 = vset.pattern.permute.xlu1 %v1599_v56 }
 0x141   : > { %v616_v26 = vpop.permute.xlu0 %615  ;;  %924 = vperm.xlu2 %1516, %v1717_v6   ;;  %1020 = vperm.xlu1 %1517, %v1726_v8   ;;  %v612_v28 = vpop.permute.xlu1 %611 }
 0x142   : > { %v792_v29 = vpop.permute.xlu2 %791  ;;  %v633_v30 = vsel %vm631_vm3, %v1914_v18, %v612_v28  ;;  %v634_v25 = vsel %vm631_vm3, %v612_v28, %v614_v48  ;;  %v565_v48 = vadd.f32 %v547_v16, %v477_v47 }
 0x143   : > { %v651_v31 = vadd.f32 %v633_v30, %v563_v51  ;;  %v652_v34 = vadd.f32 %v634_v25, %v564_v20 }
 0x145   : > { %v739_v38 = vadd.f32 %v721_v63, %v651_v31  ;;  %v740_v39 = vadd.f32 %v722_v62, %v652_v34 }
 0x147   : > { %v1973_v40 = vadd.f32 %v809_v7, %v739_v38 }
 0x149   : > { %v794_v41 = vpop.permute.xlu0 %793  ;;  %1520 = vset.pattern.permute.xlu2 %v1599_v56  ;;  %1519 = vset.pattern.permute.xlu1 %v1601_v37  ;;  %v790_v27 = vpop.permute.xlu1 %789 }
 0x14a   : > { %v811_v42 = vsel %vm807_vm5, %v792_v29, %v794_v41  ;;  %1012 = vperm.xlu2 %1520, %v1717_v6   ;;  %v534_v44 = vpop.permute.xlu2 %533  ;;  %v810_v18 = vsel %vm807_vm5, %v788_v33, %v790_v27  ;;  %1108 = vperm.xlu1 %1519, %v1726_v8   ;;  %v478_v33 = vmul.f32 %v1766_v21, %v1818_v5 }
 0x14b   : > { %v1979_v45 = vadd.f32 %v810_v18, %v740_v39  ;;  %v481_v18 = vmul.f32 %v1772_v24, %v1881_v59 }
 0x151   : > { %v622_v49 = vpop.permute.xlu0 %621  ;;  %v618_v51 = vpop.permute.xlu1 %617 }
 0x152   : > { %1521 = vset.pattern.permute.xlu2 %v1601_v37  ;;  %v620_v12 = vpop.permute.xlu2 %619  ;;  %v635_v54 = vsel %vm631_vm3, %v616_v26, %v618_v51  ;;  %1104 = vperm.xlu1 %1519, %v1707_v3  }
 0x153   : > { %v637_v55 = vsel %vm631_vm3, %v620_v12, %v622_v49  ;;  %v636_v56 = vsel %vm631_vm3, %v618_v51, %v620_v12  ;;  %v653_v57 = vadd.f32 %v635_v54, %v565_v48  ;;  %1100 = vperm.xlu2 %1521, %v1717_v6   ;;  %v479_v6 = vmul.f32 %v1766_v21, %v1858_v23 }
 0x159   : > { %v708_v8 = vpop.permute.xlu0 %707  ;;  %v704_v58 = vpop.permute.xlu1 %703 }
 0x15a   : > { %v724_v60 = vsel %vm719_vm4, %v706_v17, %v708_v8  ;;  %v798_v61 = vpop.permute.xlu2 %797  ;;  %v723_v62 = vsel %vm719_vm4, %v704_v58, %v706_v17  ;;  %1522 = vset.pattern.permute.xlu1 %v1589_v2 }
 0x15b   : > { %v741_v63 = vadd.f32 %v723_v62, %v653_v57  ;;  %1524 = vset.pattern.permute.xlu2 %v1589_v2 }
 0x15d   : > { %v1992_v3 = vadd.f32 %v811_v42, %v741_v63 }
 0x161   : > { %v536_v0 = vpop.permute.xlu0 %535  ;;  %v532_v1 = vpop.permute.xlu1 %531 }
 0x162   : > { %v626_v7 = vpop.permute.xlu2 %625  ;;  %v548_v9 = vsel %vm543_vm2, %v530_v11, %v532_v1  ;;  %v549_v10 = vsel %vm543_vm2, %v532_v1, %v534_v44  ;;  %v482_v11 = vmul.f32 %v1772_v24, %v1903_v22  ;;  %v480_v44 = vmul.f32 %v1772_v24, %v1869_v50 }
 0x163   : > { %v566_v43 = vadd.f32 %v548_v9, %v478_v33  ;;  %v567_v14 = vadd.f32 %v549_v10, %v479_v6 }
 0x165   : > { %v654_v15 = vadd.f32 %v636_v56, %v566_v43  ;;  %v655_v16 = vadd.f32 %v637_v55, %v567_v14 }
 0x167   : > { %v742_v2 = vadd.f32 %v724_v60, %v654_v15 }
 0x169   : > { %v714_v17 = vpop.permute.xlu0 %713  ;;  %v710_v19 = vpop.permute.xlu1 %709 }
 0x16a   : > { %v712_v20 = vpop.permute.xlu2 %711  ;;  %v725_v26 = vsel %vm719_vm4, %v708_v8, %v710_v19 }
 0x16b   : > { %v726_v28 = vsel %vm719_vm4, %v712_v20, %v714_v17  ;;  %v743_v29 = vadd.f32 %v725_v26, %v655_v16 }
 0x171   : > { %v542_v21 = vpop.permute.xlu0 %541  ;;  %v796_v30 = vpop.permute.xlu1 %795 }
 0x172   : > { %v540_v25 = vpop.permute.xlu2 %539  ;;  %v812_v31 = vsel %vm807_vm5, %v794_v41, %v796_v30  ;;  %v813_v34 = vsel %vm807_vm5, %v796_v30, %v798_v61 }
 0x173   : > { %v552_v38 = vsel %vm543_vm2, %v540_v25, %v542_v21  ;;  %v2007_v39 = vadd.f32 %v812_v31, %v742_v2  ;;  %v2009_v37 = vadd.f32 %v813_v34, %v743_v29 }
 0x174   : > { %v570_v27 = vadd.f32 %v552_v38, %v482_v11 }
 0x179   : > { %v628_v42 = vpop.permute.xlu0 %627  ;;  %v538_v47 = vpop.permute.xlu1 %537 }
 0x17a   : > { %v639_v48 = vsel %vm631_vm3, %v626_v7, %v628_v42  ;;  %v718_v41 = vpop.permute.xlu2 %717  ;;  %v550_v49 = vsel %vm543_vm2, %v536_v0, %v538_v47  ;;  %v551_v51 = vsel %vm543_vm2, %v538_v47, %v540_v25 }
 0x17b   : > { %v568_v12 = vadd.f32 %v550_v49, %v480_v44  ;;  %v569_v54 = vadd.f32 %v551_v51, %v481_v18 }
 0x17d   : > { %v657_v55 = vadd.f32 %v639_v48, %v569_v54 }
 0x181   : > { %v800_v56 = vpop.permute.xlu0 %799  ;;  %v624_v57 = vpop.permute.xlu1 %623 }
 0x182   : > { %v804_v8 = vpop.permute.xlu2 %803  ;;  %v638_v58 = vsel %vm631_vm3, %v624_v57, %v626_v7 }
 0x183   : > { %v656_v60 = vadd.f32 %v638_v58, %v568_v12 }
 0x185   : > { %v744_v61 = vadd.f32 %v726_v28, %v656_v60 }
 0x189   : > { %v806_v62 = vpop.permute.xlu0 %805  ;;  %v630_v24 = vpop.permute.xlu1 %629 }
 0x18a   : > { %v816_v63 = vsel %vm807_vm5, %v804_v8, %v806_v62  ;;  %v2020_v33 = vpop.permute.xlu2 %840  ;;  %v640_v0 = vsel %vm631_vm3, %v628_v42, %v630_v24 }
 0x18b   : > { %v658_v6 = vadd.f32 %v640_v0, %v570_v27  ;;  %v853_v1 = vmul.f32 %v2020_v33, %v1858_v23  ;;  %v852_v12 = vmul.f32 %v2020_v33, %v1818_v5  ;;  %v851_v0 = vmul.f32 %v2020_v33, %v1829_v13 }
 0x18d   : > { %883 = vrot.lane.b32.xlu2 %v853_v1, %s1602_s9 }
 0x191   : > { %v845_v9 = vpop.permute.xlu0 %844  ;;  %v716_v10 = vpop.permute.xlu1 %715 }
 0x192   : > { %v727_v7 = vsel %vm719_vm4, %v714_v17, %v716_v10  ;;  %v728_v43 = vsel %vm719_vm4, %v716_v10, %v718_v41  ;;  %v857_v14 = vmul.f32 %v845_v9, %v1903_v22  ;;  %v858_v15 = vmul.f32 %v845_v9, %v1894_v4 }
 0x193   : > { %v745_v16 = vadd.f32 %v727_v7, %v657_v55  ;;  %v746_v2 = vadd.f32 %v728_v43, %v658_v6  ;;  %v854_v17 = vmul.f32 %v2020_v33, %v1847_v32  ;;  %v856_v11 = vmul.f32 %v845_v9, %v1881_v59  ;;  %v929_v25 = vpop.permute.xlu2 %928 }
 0x194   : > { %891 = vrot.lane.b32.xlu0 %v857_v14, %s1602_s9  ;;  %893 = vrot.lane.b32.xlu1 %v858_v15, %s1602_s9  ;;  %v941_v31 = vmul.f32 %v929_v25, %v1858_v23  ;;  %v942_v48 = vmul.f32 %v929_v25, %v1847_v32  ;;  %v855_v54 = vmul.f32 %v845_v9, %v1869_v50 }
 0x195   : > { %v2032_v19 = vadd.f32 %v816_v63, %v746_v2  ;;  %v940_v24 = vmul.f32 %v929_v25, %v1818_v5  ;;  %v939_v43 = vmul.f32 %v929_v25, %v1829_v13 }
 0x199   : > { %v802_v20 = vpop.permute.xlu1 %801 }
 0x19a   : > { %v814_v26 = vsel %vm807_vm5, %v800_v56, %v802_v20  ;;  %v815_v28 = vsel %vm807_vm5, %v802_v20, %v804_v8  ;;  %v1017_v51 = vpop.permute.xlu0 %1016 }
 0x19b   : > { %v2038_v29 = vadd.f32 %v814_v26, %v744_v61  ;;  %v2040_v21 = vadd.f32 %v815_v28, %v745_v16  ;;  %v1029_v55 = vmul.f32 %v1017_v51, %v1858_v23  ;;  %v925_v56 = vpop.permute.xlu2 %924  ;;  %v1030_v61 = vmul.f32 %v1017_v51, %v1847_v32  ;;  %v1189_v26 = vld [vmem:[%s2296_s4 + $0x10] sm:$0xff] }
 0x19c   : > { %885 = vrot.lane.b32.xlu0 %v854_v17, %s1602_s9  ;;  %v937_v8 = vmul.f32 %v925_v56, %v1792_v46  ;;  %v938_v58 = vmul.f32 %v925_v56, %v1802_v53  ;;  %v936_v14 = vmul.f32 %v925_v56, %v1782_v36  ;;  %v1028_v16 = vmul.f32 %v1017_v51, %v1818_v5 }
 0x19d   : > { %v1027_v17 = vmul.f32 %v1017_v51, %v1829_v13 }
 0x1a1   : > { %v2043_v30 = vpop.permute.xlu1 %836 }
 0x1a2   : > { %v850_v44 = vmul.f32 %v2043_v30, %v1802_v53  ;;  %v849_v18 = vmul.f32 %v2043_v30, %v1792_v46  ;;  %v848_v63 = vmul.f32 %v2043_v30, %v1782_v36 }
 0x1a4   : > { %889 = vrot.lane.b32.xlu0 %v856_v11, %s1602_s9 }
 0x1aa   : > { %v933_v34 = vpop.permute.xlu1 %932 }
 0x1ab   : > { %v946_v38 = vmul.f32 %v933_v34, %v1894_v4  ;;  %v945_v27 = vmul.f32 %v933_v34, %v1903_v22  ;;  %v944_v49 = vmul.f32 %v933_v34, %v1881_v59  ;;  %v943_v1 = vmul.f32 %v933_v34, %v1869_v50 }
 0x1ac   : > { %971 = vrot.lane.b32.xlu0 %v941_v31, %s1603_s13  ;;  %v935_v34 = vmul.f32 %v925_v56, %v1780_v35 }
 0x1ad   : > { %981 = vrot.lane.b32.xlu2 %v946_v38, %s1603_s13  ;;  %979 = vrot.lane.b32.xlu1 %v945_v27, %s1603_s13  ;;  %v1188_v38 = vld [vmem:[%s2296_s4 + $0x8] sm:$0xff] }
 0x1b3   : > { %v2053_v42 = vpop.permute.xlu1 %1020 }
 0x1b4   : > { %v1034_v47 = vmul.f32 %v2053_v42, %v1894_v4  ;;  %v1033_v41 = vmul.f32 %v2053_v42, %v1903_v22  ;;  %v1032_v9 = vmul.f32 %v2053_v42, %v1881_v59  ;;  %v1031_v2 = vmul.f32 %v2053_v42, %v1869_v50 }
 0x1b5   : > { %877 = vrot.lane.b32.xlu2 %v850_v44, %s1602_s9  ;;  %875 = vrot.lane.b32.xlu1 %v849_v18, %s1602_s9 }
 0x1b6   : > { %1069 = vrot.lane.b32.xlu0 %v1034_v47, %s1604_s14 }
 0x1bc   : > { %v2078_v57 = vpop.permute.xlu1 %1108 }
 0x1bd   : > { %973 = vrot.lane.b32.xlu1 %v942_v48, %s1603_s13  ;;  %1067 = vrot.lane.b32.xlu2 %v1033_v41, %s1604_s14  ;;  %v1122_v60 = vmul.f32 %v2078_v57, %v1894_v4  ;;  %v1121_v62 = vmul.f32 %v2078_v57, %v1903_v22  ;;  %v2094_v4 = vpop.permute.xlu2 %1012  ;;  %v1120_v15 = vmul.f32 %v2078_v57, %v1881_v59 }
 0x1be   : > { %977 = vrot.lane.b32.xlu0 %v944_v49, %s1603_s13  ;;  %v1025_v6 = vmul.f32 %v2094_v4, %v1792_v46  ;;  %v1026_v33 = vmul.f32 %v2094_v4, %v1802_v53  ;;  %v1119_v18 = vmul.f32 %v2078_v57, %v1869_v50  ;;  %v1023_v50 = vmul.f32 %v2094_v4, %v1780_v35 }
 0x1c4   : > { %v2105_v22 = vpop.permute.xlu1 %1104 }
 0x1c5   : > { %881 = vrot.lane.b32.xlu1 %v852_v12, %s1602_s9  ;;  %887 = vrot.lane.b32.xlu2 %v855_v54, %s1602_s9  ;;  %v1118_v10 = vmul.f32 %v2105_v22, %v1847_v32  ;;  %v1117_v7 = vmul.f32 %v2105_v22, %v1858_v23  ;;  %v847_v32 = vmul.f32 %v2043_v30, %v1780_v35  ;;  %v1101_v23 = vpop.permute.xlu2 %1100 }
 0x1c6   : > { %1059 = vrot.lane.b32.xlu0 %v1029_v55, %s1604_s14  ;;  %v1114_v20 = vmul.f32 %v1101_v23, %v1802_v53  ;;  %v1113_v28 = vmul.f32 %v1101_v23, %v1792_v46  ;;  %v1024_v46 = vmul.f32 %v2094_v4, %v1782_v36  ;;  %v1116_v47 = vmul.f32 %v2105_v22, %v1818_v5 }
 0x1c7   : > { %v1111_v48 = vmul.f32 %v1101_v23, %v1780_v35  ;;  %v1112_v12 = vmul.f32 %v1101_v23, %v1782_v36  ;;  %v1187_v36 = vld [vmem:[%s2296_s4] sm:$0xff]  ;;  %v1115_v35 = vmul.f32 %v2105_v22, %v1829_v13 }
 0x1cd   : > { %963 = vrot.lane.b32.xlu1 %v937_v8, %s1603_s13  ;;  %965 = vrot.lane.b32.xlu2 %v938_v58, %s1603_s13 }
 0x1ce   : > { %1157 = vrot.lane.b32.xlu0 %v1122_v60, %s1605_s15 }
 0x1d5   : > { %1061 = vrot.lane.b32.xlu1 %v1030_v61, %s1604_s14  ;;  %1155 = vrot.lane.b32.xlu2 %v1121_v62, %s1605_s15 }
 0x1d6   : > { %969 = vrot.lane.b32.xlu0 %v940_v24, %s1603_s13 }
 0x1dd   : > { %873 = vrot.lane.b32.xlu1 %v848_v63, %s1602_s9  ;;  %879 = vrot.lane.b32.xlu2 %v851_v0, %s1602_s9  ;;  %v1233_v63 = vld [vmem:[%s2298_s6] sm:$0xf] }
 0x1de   : > { %1051 = vrot.lane.b32.xlu0 %v1025_v6, %s1604_s14 }
 0x1e5   : > { %975 = vrot.lane.b32.xlu1 %v943_v1, %s1603_s13  ;;  %1065 = vrot.lane.b32.xlu2 %v1032_v9, %s1604_s14 }
 0x1e6   : > { %1149 = vrot.lane.b32.xlu0 %v1118_v10, %s1605_s15 }
 0x1e7   : > { %v2138_v59 = vpop.permute.xlu2 %883 }
 0x1ed   : > { %1053 = vrot.lane.b32.xlu1 %v1026_v33, %s1604_s14  ;;  %1147 = vrot.lane.b32.xlu2 %v1117_v7, %s1605_s15 }
 0x1ee   : > { %967 = vrot.lane.b32.xlu0 %v939_v43, %s1603_s13 }
 0x1f5   : > { %871 = vrot.lane.b32.xlu1 %v847_v32, %s1602_s9  ;;  %961 = vrot.lane.b32.xlu2 %v936_v14, %s1603_s13  ;;  %s1545_s9 = scalar_lea.hbm %s2299_s7, 24 }
 0x1f6   : > { %1153 = vrot.lane.b32.xlu0 %v1120_v15, %s1605_s15 }
 0x1fd   : > { %1057 = vrot.lane.b32.xlu1 %v1028_v16, %s1604_s14  ;;  %1063 = vrot.lane.b32.xlu2 %v1031_v2, %s1604_s14 }
 0x1fe   : > { %1141 = vrot.lane.b32.xlu0 %v1114_v20, %s1605_s15 }
 0x205   : > { %1202 = vperm.xlu1 %1522, %v1189_v26   ;;  %1139 = vrot.lane.b32.xlu2 %v1113_v28, %s1605_s15 }
 0x206   : > { %v892_v53 = vpop.permute.xlu0 %891  ;;  %v894_v30 = vpop.permute.xlu1 %893  ;;  %1055 = vrot.lane.b32.xlu0 %v1027_v17, %s1604_s14 }
 0x207   : > { %v904_v11 = vsel %vm895_vm6, %v892_v53, %v894_v30  ;;  %v982_v25 = vpop.permute.xlu2 %981 }
 0x208   : > { %v922_v31 = vadd.f32 %v904_v11, %v2032_v19 }
 0x20d   : > { %959 = vrot.lane.b32.xlu1 %v935_v34, %s1603_s13  ;;  %1049 = vrot.lane.b32.xlu2 %v1024_v46, %s1604_s14 }
 0x20e   : > { %v886_v27 = vpop.permute.xlu0 %885  ;;  %1197 = vperm.xlu0 %1523, %v1188_v38  }
 0x20f   : > { %v901_v42 = vsel %vm895_vm6, %v2138_v59, %v886_v27  ;;  %v878_v44 = vpop.permute.xlu2 %877 }
 0x210   : > { %v919_v19 = vadd.f32 %v901_v42, %v2009_v37 }
 0x215   : > { %1151 = vrot.lane.b32.xlu2 %v1119_v18, %s1605_s15  ;;  %1145 = vrot.lane.b32.xlu1 %v1116_v47, %s1605_s15 }
 0x216   : > { %v890_v41 = vpop.permute.xlu0 %889  ;;  %1135 = vrot.lane.b32.xlu0 %v1111_v48, %s1605_s15 }
 0x217   : > { %v903_v49 = vsel %vm895_vm6, %v890_v41, %v892_v53  ;;  %v1068_v51 = vpop.permute.xlu2 %1067 }
 0x218   : > { %v921_v37 = vadd.f32 %v903_v49, %v2040_v21 }
 0x21d   : > { %1137 = vrot.lane.b32.xlu2 %v1112_v12, %s1605_s15  ;;  %1047 = vrot.lane.b32.xlu1 %v1023_v50, %s1604_s14 }
 0x21e   : > { %v972_v55 = vpop.permute.xlu0 %971 }
 0x21f   : > { %v888_v5 = vpop.permute.xlu2 %887  ;;  %v980_v54 = vpop.permute.xlu1 %979 }
 0x220   : > { %v902_v56 = vsel %vm895_vm6, %v888_v5, %v890_v41  ;;  %v992_v57 = vsel %vm983_vm7, %v980_v54, %v982_v25 }
 0x221   : > { %v920_v8 = vadd.f32 %v902_v56, %v2038_v29  ;;  %v1010_v21 = vadd.f32 %v992_v57, %v922_v31 }
 0x225   : > { %1192 = vperm.xlu2 %1524, %v1187_v36   ;;  %1143 = vrot.lane.b32.xlu1 %v1115_v35, %s1605_s15  ;;  %s1440_s15 = smul.u32 12, %s1667_s28 }
 0x227   : > { %v966_v58 = vpop.permute.xlu2 %965  ;;  %v876_v60 = vpop.permute.xlu1 %875  ;;  %s1346_s18 = scalar_lea.hbm %s2299_s7, %s1440_s15 }
 0x228   : > { %v898_v61 = vsel %vm895_vm6, %v876_v60, %v878_v44  ;;  %v1070_v62 = vpop.permute.xlu0 %1069  ;;  %s1350_s20 = sshll.u32 %s1346_s18, 4  ;;  %s1351_s20 = int_to_ptr.hbm [resolvable:$true] %s1350_s20 }
 0x229   : > { %v916_v24 = vadd.f32 %v898_v61, %v1979_v45  ;;  %v1080_v29 = vsel %vm1071_vm8, %v1068_v51, %v1070_v62  ;;  %s1539_s21 = sshra.s32 %s1351_s20, 4  ;;  %s1540_s21 = int_to_ptr.hbm [resolvable:$true] %s1539_s21 }
 0x22a   : > { %v1098_v4 = vadd.f32 %v1080_v29, %v1010_v21  ;;  %s1541_s22 = scalar_lea.hbm %s1540_s21, 12  ;;  %p1546_p0 = scmp.lt.s32.totalorder %s1540_s21, %s2299_s7 }
 0x22b   : > { %p1542_p11 = scmp.ne.s32.totalorder %s1540_s21, %s1541_s22  ;;  %p1547_p1 = scmp.lt.s32.totalorder %s1545_s9, %s1541_s22 }
 0x22d   : > { %1236 = vperm.xlu1 %1522, %v1233_v63   ;;  %p1543_p12 = pnand %p1542_p11, %p1684_p5  ;;  %p1548_p2 = por %p1547_p1, %p1546_p0 }
 0x22f   : > { %v1156_v13 = vpop.permute.xlu2 %1155  ;;  %v974_v0 = vpop.permute.xlu1 %973  ;;  %p1544_p13 = pneg %p1543_p12 }
 0x230   : > { %v989_v6 = vsel %vm983_vm7, %v972_v55, %v974_v0  ;;  %v978_v22 = vpop.permute.xlu0 %977 }
 0x231   : > { %v1007_v1 = vadd.f32 %v989_v6, %v919_v19  ;;  %v991_v9 = vsel %vm983_vm7, %v978_v22, %v980_v54  ;;  %p1549_p3 = pnand %p1548_p2, %p1544_p13 }
 0x232   : > { %v1009_v10 = vadd.f32 %v991_v9, %v921_v37 }
 0x237   : > { %v880_v33 = vpop.permute.xlu2 %879  ;;  %v882_v7 = vpop.permute.xlu1 %881 }
 0x238   : > { %v899_v45 = vsel %vm895_vm6, %v880_v33, %v882_v7  ;;  %v900_v43 = vsel %vm895_vm6, %v882_v7, %v2138_v59  ;;  %v1060_v32 = vpop.permute.xlu0 %1059 }
 0x239   : > { %v917_v14 = vadd.f32 %v899_v45, %v1992_v3  ;;  %v918_v15 = vadd.f32 %v900_v43, %v2007_v39 }
 0x23f   : > { %v1066_v23 = vpop.permute.xlu2 %1065  ;;  %v964_v16 = vpop.permute.xlu1 %963 }
 0x240   : > { %v1079_v2 = vsel %vm1071_vm8, %v1066_v23, %v1068_v51  ;;  %v986_v20 = vsel %vm983_vm7, %v964_v16, %v966_v58  ;;  %v1158_v26 = vpop.permute.xlu0 %1157 }
 0x241   : > { %v1097_v28 = vadd.f32 %v1079_v2, %v1009_v10  ;;  %v1004_v17 = vadd.f32 %v986_v20, %v916_v24  ;;  %v1168_v53 = vsel %vm1159_vm9, %v1156_v13, %v1158_v26  ;;  %v1308_v10 = vld.sshfl [vmem:[#allocation1 + $0x10] sm:$0xff pattern:$0x75316420] }
 0x242   : > { %v1186_v30 = vadd.f32 %v1168_v53, %v1098_v4  ;;  %1314 = vrot.lane.b32.xlu0 %v1308_v10, %s1597_s8 }
 0x247   : > { %v2200_v11 = vpop.permute.xlu2 %1147  ;;  %v1062_v59 = vpop.permute.xlu1 %1061 }
 0x248   : > { %v1077_v3 = vsel %vm1071_vm8, %v1060_v32, %v1062_v59  ;;  %v970_v25 = vpop.permute.xlu0 %969 }
 0x249   : > { %v1095_v39 = vadd.f32 %v1077_v3, %v1007_v1  ;;  %v988_v31 = vsel %vm983_vm7, %v970_v25, %v972_v55 }
 0x24a   : > { %v1006_v34 = vadd.f32 %v988_v31, %v918_v15 }
 0x24f   : > { %v962_v46 = vpop.permute.xlu2 %961  ;;  %v874_v38 = vpop.permute.xlu1 %873 }
 0x250   : > { %v897_v27 = vsel %vm895_vm6, %v874_v38, %v876_v60  ;;  %v1052_v42 = vpop.permute.xlu0 %1051  ;;  %v985_v19 = vsel %vm983_vm7, %v962_v46, %v964_v16 }
 0x251   : > { %v915_v44 = vadd.f32 %v897_v27, %v1973_v40  ;;  %v1307_v27 = vld.sshfl [vmem:[#allocation1 + $0x8] sm:$0xff pattern:$0x75316420] }
 0x252   : > { %1312 = vrot.lane.b32.xlu2 %v1307_v27, %s1597_s8 }
 0x253   : > { %v1003_v18 = vadd.f32 %v985_v19, %v915_v44  ;;  %v1306_v19 = vld.sshfl [vmem:[#allocation1] sm:$0xff pattern:$0x75316420] }
 0x254   : > { %1310 = vrot.lane.b32.xlu1 %v1306_v19, %s1597_s8 }
 0x257   : > { %v1064_v47 = vpop.permute.xlu2 %1063  ;;  %v976_v48 = vpop.permute.xlu1 %975 }
 0x258   : > { %v990_v41 = vsel %vm983_vm7, %v976_v48, %v978_v22  ;;  %v1150_v49 = vpop.permute.xlu0 %1149  ;;  %v1078_v24 = vsel %vm1071_vm8, %v1064_v47, %v1066_v23 }
 0x259   : > { %v1008_v51 = vadd.f32 %v990_v41, %v920_v8  ;;  %v1165_v43 = vsel %vm1159_vm9, %v2200_v11, %v1150_v49 }
 0x25a   : > { %v1183_v20 = vadd.f32 %v1165_v43, %v1095_v39 }
 0x25b   : > { %v1096_v4 = vadd.f32 %v1078_v24, %v1008_v51  ;;  %v1309_v51 = vld.sshfl [vmem:[#allocation1 + $0x18] sm:$0xff pattern:$0x75316420] }
 0x25c   : > { %1316 = vrot.lane.b32.xlu2 %v1309_v51, %s1597_s8  ;;  %s269_s8 = sand.u32 1, %s1579_s25  }
 0x25d   : > { %s1439_s13 = smul.u32 12, %s269_s8  ;;  %s1335_s28 = scalar_lea.sflag [#allocation3], %s269_s8 }
 0x25f   : > { %v1140_v37 = vpop.permute.xlu2 %1139  ;;  %v1054_v12 = vpop.permute.xlu1 %1053  ;;  %s271_s14 = scalar_lea.vmem [#allocation2], %s1439_s13 }
 0x260   : > { %v968_v50 = vpop.permute.xlu0 %967  ;;  %v1074_v9 = vsel %vm1071_vm8, %v1052_v42, %v1054_v12  ;;  %s1348_s19 = sshll.u32 %s271_s14, 4  ;;  %s1349_s19 = int_to_ptr.vmem [resolvable:$true] %s1348_s19 }
 0x261   : > { %v987_v5 = vsel %vm983_vm7, %v968_v50, %v970_v25 }
 0x262   : > { %v2209_v54 = vadd.f32 %v987_v5, %v917_v14  ;;  %v1092_v14 = vadd.f32 %v1074_v9, %v1004_v17 }
 0x267   : > { %v2211_v55 = vpop.permute.xlu2 %1049  ;;  %v872_v56 = vpop.permute.xlu1 %871 }
 0x268   : > { %v896_v40 = vsel %vm895_vm6, %v872_v56, %v874_v38  ;;  %v1154_v57 = vpop.permute.xlu0 %1153  ;;  %v1073_v31 = vsel %vm1071_vm8, %v2211_v55, %v1052_v42  ;;  %v1232_v42 = vld [vmem:[%s2297_s5] sm:$0xf] }
 0x269   : > { %v914_v21 = vadd.f32 %v896_v40, %v1960_v52  ;;  %v1167_v36 = vsel %vm1159_vm9, %v1154_v57, %v1156_v13  ;;  %v1091_v44 = vadd.f32 %v1073_v31, %v1003_v18 }
 0x26a   : > { %v1185_v35 = vadd.f32 %v1167_v36, %v1097_v28 }
 0x26f   : > { %v1152_v58 = vpop.permute.xlu2 %1151  ;;  %v2216_v8 = vpop.permute.xlu1 %1057 }
 0x270   : > { %v1076_v60 = vsel %vm1071_vm8, %v2216_v8, %v1060_v32  ;;  %v1142_v61 = vpop.permute.xlu0 %1141  ;;  %v1166_v29 = vsel %vm1159_vm9, %v1152_v58, %v1154_v57 }
 0x271   : > { %v1094_v62 = vadd.f32 %v1076_v60, %v1006_v34  ;;  %v1184_v63 = vadd.f32 %v1166_v29, %v1096_v4  ;;  %v1162_v32 = vsel %vm1159_vm9, %v1140_v37, %v1142_v61 }
 0x272   : > { %v1180_v2 = vadd.f32 %v1162_v32, %v1092_v14 }
 0x277   : > { %v2222_v0 = vpop.permute.xlu2 %1137  ;;  %v1203_v52 = vpop.permute.xlu1 %1202 }
 0x278   : > { %v2224_v6 = vpop.permute.xlu0 %1055  ;;  %v1211_v13 = vadd.f32 %v1203_v52, %v1184_v63  ;;  %v1212_v22 = vadd.f32 %v1203_v52, %v1185_v35  ;;  %v1213_v1 = vadd.f32 %v1203_v52, %v1186_v30  ;;  %v1161_v38 = vsel %vm1159_vm9, %v2222_v0, %v1140_v37 }
 0x279   : > { %v1075_v36 = vsel %vm1071_vm8, %v2224_v6, %v2216_v8 }
 0x27a   : > { %v1220_v33 = vmax.f32 %v1211_v13, 0.0  ;;  %v1221_v7 = vmax.f32 %v1212_v22, 0.0  ;;  %v1222_v45 = vmax.f32 %v1213_v1, 0.0  ;;  %v1093_v60 = vadd.f32 %v1075_v36, %v2209_v54 }
 0x27c   : > { %v1229_v15 = vmin.f32 %v1220_v33, 6.0  ;;  %v1230_v23 = vmin.f32 %v1221_v7, 6.0  ;;  %v1231_v16 = vmin.f32 %v1222_v45, 6.0 }
 0x27e   : > { %1256 = vmatpush.msrb.mxu0 %v1229_v15  ;;  %1276 = vmatpush.msrb.mxu1 %v1230_v23 }
 0x27f   : > { %1296 = vmatpush.msrb.mxu2 %v1231_v16  ;;  %v1193_v26 = vpop.permute.xlu2 %1192  ;;  %v960_v28 = vpop.permute.xlu1 %959 }
 0x280   : > { %v984_v53 = vsel %vm983_vm7, %v960_v28, %v962_v46  ;;  %v1198_v30 = vpop.permute.xlu0 %1197  ;;  %v1207_v59 = vadd.f32 %v1193_v26, %v1180_v2  ;;  %v1179_v46 = vadd.f32 %v1161_v38, %v1091_v44 }
 0x281   : > { %v1002_v3 = vadd.f32 %v984_v53, %v914_v21  ;;  %v1210_v25 = vadd.f32 %v1198_v30, %v1183_v20 }
 0x282   : > { %v1216_v34 = vmax.f32 %v1207_v59, 0.0  ;;  %v1206_v18 = vadd.f32 %v1193_v26, %v1179_v46 }
 0x283   : > { %v1219_v17 = vmax.f32 %v1210_v25, 0.0 }
 0x284   : > { %v1225_v48 = vmin.f32 %v1216_v34, 6.0  ;;  %v1215_v50 = vmax.f32 %v1206_v18, 0.0 }
 0x285   : > { %v1228_v39 = vmin.f32 %v1219_v17, 6.0 }
 0x287   : > { %1297 = vmatpush.msrb.mxu2 %v1228_v39  ;;  %v1146_v47 = vpop.permute.xlu1 %1145 }
 0x288   : > { %v1164_v41 = vsel %vm1159_vm9, %v1146_v47, %v2200_v11  ;;  %v1136_v57 = vpop.permute.xlu0 %1135  ;;  %v1224_v11 = vmin.f32 %v1215_v50, 6.0 }
 0x289   : > { %v1182_v49 = vadd.f32 %v1164_v41, %v1094_v62  ;;  %1298 = vmatpush.msrb.mxu2 %v1225_v48  ;;  %v1160_v35 = vsel %vm1159_vm9, %v1136_v57, %v2222_v0 }
 0x28a   : > { %1434 = vmatmul.msk.f32.vlgmr.msrb.gmra.mxu2 %vm1239_vm10, %v1232_v42 }
 0x28b   : > { %v1209_v37 = vadd.f32 %v1198_v30, %v1182_v49 }
 0x28d   : > { %v1218_v12 = vmax.f32 %v1209_v37, 0.0 }
 0x28f   : > { %v1048_v5 = vpop.permute.xlu1 %1047  ;;  %v1227_v56 = vmin.f32 %v1218_v12, 6.0 }
 0x290   : > { %v1072_v40 = vsel %vm1071_vm8, %v1048_v5, %v2211_v55 }
 0x291   : > { %v1090_v21 = vadd.f32 %v1072_v40, %v1002_v3  ;;  %1277 = vmatpush.msrb.mxu1 %v1227_v56 }
 0x293   : > { %1278 = vmatpush.msrb.mxu1 %v1224_v11  ;;  %v1178_v58 = vadd.f32 %v1160_v35, %v1090_v21 }
 0x294   : > { %1433 = vmatmul.msk.f32.vlgmr.msrb.gmra.mxu1 %vm1239_vm10, %v1232_v42 }
 0x295   : > { %v1205_v24 = vadd.f32 %v1193_v26, %v1178_v58 }
 0x297   : > { %v1144_v61 = vpop.permute.xlu1 %1143  ;;  %v1214_v63 = vmax.f32 %v1205_v24, 0.0 }
 0x298   : > { %v1163_v55 = vsel %vm1159_vm9, %v1144_v61, %v1146_v47 }
 0x299   : > { %v1181_v62 = vadd.f32 %v1163_v55, %v1093_v60  ;;  %v1223_v8 = vmin.f32 %v1214_v63, 6.0 }
 0x29b   : > { %v1208_v29 = vadd.f32 %v1198_v30, %v1181_v62 }
 0x29d   : > { %v1217_v4 = vmax.f32 %v1208_v29, 0.0 }
 0x29f   : > { %v1226_v52 = vmin.f32 %v1217_v4, 6.0  ;;  %v1237_v54 = vpop.permute.xlu1 %1236 }
 0x2a1   : > { %1257 = vmatpush.msrb.mxu0 %v1226_v52 }
 0x2a3   : > { %1258 = vmatpush.msrb.mxu0 %v1223_v8 }
 0x2a4   : > { %1432 = vmatmul.msk.f32.vlgmr.msrb.gmra.mxu0 %vm1239_vm10, %v1232_v42 }
 0x2ac   : > { %v1313_v0 = vpop.permute.xlu2 %1312 }
 0x2b4   : > { %v1315_v6 = vpop.permute.xlu0 %1314 }
 0x2b5   : > { %v1319_v45 = vsel %vm807_vm5, %v1313_v0, %v1315_v6 }
 0x2b6   : > { %v1317_v13 = vpop.permute.xlu2 %1316 }
 0x2b7   : > { %v1320_v1 = vsel %vm807_vm5, %v1315_v6, %v1317_v13 }
 0x2c6   : > { %v1311_v32 = vpop.permute.xlu1 %1310 }
 0x2c7   : > { %v1318_v23 = vsel %vm807_vm5, %v1311_v32, %v1313_v0 }
 0x30d   : > { %v1300_v22 = vpop.f32.mrf.mxu2 }
 0x30e   : > { %v1301_v9 = vadd.f32 %v1300_v22, %v1237_v54 }
 0x310   : > { %v1326_v10 = vadd.f32 %v1320_v1, %v1301_v9 }
 0x311   : > { %v1280_v33 = vpop.f32.mrf.mxu1 }
 0x312   : > { %1333 = vst [vmem:[%s271_s14 + $0x8] sm:$0xf] %v1326_v10  ;;  %v1281_v7 = vadd.f32 %v1280_v33, %v1237_v54 }
 0x314   : > { %v1325_v43 = vadd.f32 %v1319_v45, %v1281_v7 }
 0x316   : > { %v1329_v16 = vrot.slane %v1325_v43, 4 }
 0x321   : > { %v1260_v14 = vpop.f32.mrf.mxu0 }
 0x322   : > { %v1261_v15 = vadd.f32 %v1260_v14, %v1237_v54 }
 0x324   : > { %v1324_v2 = vadd.f32 %v1318_v23, %v1261_v15 }
 0x326   : > { %v1330_v20 = vsel %vm319_vm0, %v1324_v2, %v1329_v16 }
 0x327   : > { %1332 = vst [vmem:[%s271_s14] sm:$0xff] %v1330_v20 }
 0x328   : > { %1552 = shalt.err (!%p1549_p3)
}
 0x329   : > { %1441 = dma.vmem_to_hbm [thread:$0]  (%p1684_p5), %s1349_s19, 192, %s1351_s20, %s1335_s28  }
 0x32a PF: > { %p1447_p4 = scmp.ge.s32.totalorder %s1587_s27, 2  ;;  %s1362_s8 = sand.u32 1, %s1575_s24  }
 0x32b   : > { %s1363_s14 = scalar_lea.sflag [#allocation3], %s1362_s8 }
 0x32c   : > { %p1444_p7 = pnand %p1447_p4, %p1688_p6 }
 0x32e   : > { %p1445_p8 = pneg %p1444_p7 }
 0x330   : > { %1570 = dma.done.wait (%p1445_p8), %s1363_s14, 192  }
 0x331   : > { %1572 = vsyncadd (%p1445_p8), %s1363_s14, 4294967104  ;;  %p17_p9 = scmp.ge.s32.totalorder %s1671_s30, 4   ;;  %s2302_s24 = smov %s1579_s25 }
 0x332   : > { %s2303_s25 = smov %s1583_s26  ;;  %s2304_s26 = smov %s1682_s10 }
 0x333   : > { %s2305_s27 = smov %s1671_s30  ;;  %19 = sbr.rel (!%p17_p9) target bundleno = 3 (0x3), region = 85 }
 0x338   :  { %1369 = vsyncpa [#allocation3], 1 }
 0x339   :  { %1371 = vsyncpa [#allocation3 + $0x1], 1 }

</bundles_post_ra>
